<compile_context>
chip_gen: v5e
topology: v5e:2x2
jax: 0.10.0
libtpu: 0.0.40
codegen_flags: <defaults>
</compile_context>

<pallas_src>
import jax
import jax.numpy as jnp
from jax.experimental import pallas as pl
from jax.experimental.pallas import tpu as pltpu

# ----------------------------- synthetic config -----------------------------
B = 2
H = 16
W = 16
N_PR_VARS = 4                     # mesh.n_pr_vars  (Cpr)
N_LEVELS = 4                      # mesh.n_levels   (D)
N_PR = N_PR_VARS * N_LEVELS       # mesh.n_pr       (16)
N_SFC_VARS = 3                    # mesh.n_sfc_vars
N_ADDL_VARS = 2
N_CONST_VARS = 2                  # len(cvars) from get_constant_vars
TOTAL_SFC = N_SFC_VARS + N_ADDL_VARS + N_CONST_VARS   # 7
LATENT = 32                       # config.latent_size
PATCH = (2, 4, 4)                 # config.patch_size  (pd, ph, pw)
WINDOW = (2, 4, 4)                # config.window_size

LANE = 128                        # TPU lane width; pad K / N to multiples of this


def _round_up(n, m):
    return (n + m - 1) // m * m


def _pad2d(a, rows, cols):
    return jnp.pad(a, ((0, rows - a.shape[0]), (0, cols - a.shape[1])))


# ------------------------------ Pallas kernel --------------------------------
def _fused_patch_embed_kernel(xp_ref, xs_ref, wp_ref, ws_ref, pep_ref, pes_ref,
                              o_ref):
    """Both patch-embedding convs + nan-clean + (bias+posemb) epilogue.

    xp_ref : (B*Tpr, Kp)   bf16  pressure im2col patches
    xs_ref : (B*Tsf, Ks)   bf16  surface  im2col patches (K zero-padded)
    wp_ref : (Kp, Np)      bf16  pressure weight (zero-padded to lane-dense Np)
    ws_ref : (Ks, Np)      bf16  surface  weight
    pep_ref: (Tpr, Np)     f32   posemb[:Dp] + bias_pr   (batch-broadcast)
    pes_ref: (Tsf, Np)     f32   posemb[Dp]  + bias_sfc  (batch-broadcast)
    o_ref  : (B, Tpr+Tsf, Np) f32  depth-concatenated tokens, written directly
    """
    bsz = o_ref.shape[0]
    t_pr = pep_ref.shape[0]
    t_sf = pes_ref.shape[0]

    # Pressure branch: MXU matmul with f32 accumulation.
    yp = jnp.dot(xp_ref[...], wp_ref[...], preferred_element_type=jnp.float32)

    # Surface branch: nan-clean fused (matches torch.nan_to_num on the sfc
    # slice; addl/const channels and zero K-padding are never NaN so cleaning
    # the whole im2col block is equivalent). Free VPU filler under the matmuls.
    xs = jnp.nan_to_num(xs_ref[...], nan=0.0)
    ys = jnp.dot(xs, ws_ref[...], preferred_element_type=jnp.float32)

    # Fused epilogue: bias was pre-folded into posemb; write the concatenated
    # [pressure tokens | surface tokens] layout directly (no jnp.concatenate).
    o_ref[:, :t_pr, :] = yp.reshape(bsz, t_pr, -1) + pep_ref[...]
    o_ref[:, t_pr:, :] = ys.reshape(bsz, t_sf, -1) + pes_ref[...]


def fused_patch_embed(xp, xs, w_pr, w_sfc, pe_pr, pe_sfc, batch):
    """Single-launch, single-grid-step fused encoder patch embedding."""
    t_pr, n_lat = pe_pr.shape
    t_sf = pe_sfc.shape[0]
    assert xp.shape == (batch * t_pr, w_pr.shape[0])
    assert xs.shape == (batch * t_sf, w_sfc.shape[0])
    assert w_pr.shape[1] == n_lat and w_sfc.shape[1] == n_lat
    assert n_lat % LANE == 0
    assert w_pr.shape[0] % LANE == 0 and w_sfc.shape[0] % LANE == 0

    vmem = pltpu.MemorySpace.VMEM
    return pl.pallas_call(
        _fused_patch_embed_kernel,
        out_shape=jax.ShapeDtypeStruct((batch, t_pr + t_sf, n_lat), jnp.float32),
        # Whole arrays resident in VMEM, no grid: ~200 KiB total at this size,
        # so per-step pipeline / launch overhead is the only thing worth saving.
        in_specs=[pl.BlockSpec(memory_space=vmem)] * 6,
        out_specs=pl.BlockSpec(memory_space=vmem),
    )(xp, xs, w_pr, w_sfc, pe_pr, pe_sfc)


# ------------------------------ plain-JAX glue --------------------------------
def get_constant_vars(h, w):
    """Deterministic constant fields (e.g. normalized lat/lon), shape (H, W, 2)."""
    lat = jnp.linspace(-1.0, 1.0, h, dtype=jnp.float32)
    lon = jnp.linspace(-1.0, 1.0, w, dtype=jnp.float32)
    lat_g, lon_g = jnp.meshgrid(lat, lon, indexing="ij")
    return jnp.stack([lat_g, lon_g], axis=-1)


def get_additional_vars(t0s, h, w):
    """Deterministic time features, shape (B, H, W, N_ADDL_VARS)."""
    feats = jnp.stack([jnp.sin(t0s), jnp.cos(t0s)], axis=-1)  # (B, 2)
    return jnp.broadcast_to(feats[:, None, None, :],
                            (t0s.shape[0], h, w, N_ADDL_VARS)).astype(jnp.float32)


def encoder_forward(x, t0s, w_pr, b_pr, w_sfc, b_sfc, posemb):
    b_, h_, w_, _ = x.shape
    pd, ph, pw = PATCH
    dp, hp, wp = N_LEVELS // pd, h_ // ph, w_ // pw
    np_lat = _round_up(LATENT, LANE)          # lane-dense output width (32 -> 128)
    t_pr = dp * hp * wp                       # pressure tokens per batch
    t_sf = hp * wp                            # surface tokens per batch

    # ---- surface branch channels: cat(sfc_vars, addl_vars, const_data)
    x_sfc = jnp.transpose(x[:, :, :, N_PR:], (0, 3, 1, 2))           # (B, n_sfc, H, W)
    addl = jnp.transpose(get_additional_vars(t0s, h_, w_), (0, 3, 1, 2))
    const = jnp.transpose(get_constant_vars(h_, w_)[None], (0, 3, 1, 2))
    const = jnp.broadcast_to(const, (b_,) + const.shape[1:])
    x_sfc = jnp.concatenate([x_sfc, addl, const], axis=1)            # (B, Csfc, H, W)

    csfc = x_sfc.shape[1]
    k_sfc = csfc * ph * pw
    k_sfc_pad = _round_up(k_sfc, LANE)                               # 112 -> 128
    # TODO(synk): at real lat/lon grid sizes, drive the patch extraction from the
    # BlockSpec index_map / in-kernel gather instead of materializing im2col.
    p2 = x_sfc.reshape(b_, csfc, hp, ph, wp, pw)
    p2 = jnp.transpose(p2, (0, 2, 4, 1, 3, 5)).reshape(b_ * t_sf, k_sfc)
    p2 = jnp.pad(p2, ((0, 0), (0, k_sfc_pad - k_sfc))).astype(jnp.bfloat16)

    # ---- pressure branch: Conv3d patch embedding (im2col)
    k_pr = N_PR_VARS * pd * ph * pw                                  # 128 already
    k_pr_pad = _round_up(k_pr, LANE)
    x_pr = x[:, :, :, :N_PR].reshape(b_, h_, w_, N_PR_VARS, N_LEVELS)
    x_pr = jnp.transpose(x_pr, (0, 3, 4, 1, 2))                      # (B, Cpr, D, H, W)
    p3 = x_pr.reshape(b_, N_PR_VARS, dp, pd, hp, ph, wp, pw)
    p3 = jnp.transpose(p3, (0, 2, 4, 6, 1, 3, 5, 7)).reshape(b_ * t_pr, k_pr)
    p3 = jnp.pad(p3, ((0, 0), (0, k_pr_pad - k_pr))).astype(jnp.bfloat16)

    # ---- weights (bf16, zero-padded lane-dense) and bias folded into posemb (f32)
    w_pr_p = _pad2d(w_pr, k_pr_pad, np_lat).astype(jnp.bfloat16)
    w_sfc_p = _pad2d(w_sfc, k_sfc_pad, np_lat).astype(jnp.bfloat16)
    # TODO(synk): exact add_posemb semantics unavailable; using a deterministic
    # synthetic positional embedding of matching shape.
    pe_pr = _pad2d(posemb[:dp].reshape(t_pr, LATENT) + b_pr[None, :], t_pr, np_lat)
    pe_sf = _pad2d(posemb[dp].reshape(t_sf, LATENT) + b_sfc[None, :], t_sf, np_lat)

    # ---- single fused kernel: both convs + nan-clean + bias+posemb epilogue,
    # output already in the depth-concatenated token layout.
    out = fused_patch_embed(p3, p2, w_pr_p, w_sfc_p, pe_pr, pe_sf, b_)
    xt = out.reshape(b_, dp + 1, hp, wp, np_lat)                     # (B, Dp+1, Hp, Wp, 128)

    # ---- tr_pad: pad token grid to multiples of window_size (still 128-lane padded)
    dt, ht, wt = xt.shape[1:4]
    xt = jnp.pad(xt, ((0, 0),
                      (0, (-dt) % WINDOW[0]),
                      (0, (-ht) % WINDOW[1]),
                      (0, (-wt) % WINDOW[2]),
                      (0, 0)))

    # TODO(synk): SlideLayers3D transformer (self.tr) source not provided; omitted.
    # Slice the padded latent exactly once, right before the (absent) consumer.
    return xt[..., :LATENT]


# ---------------------------------- main --------------------------------------
if __name__ == "__main__":
    key = jax.random.PRNGKey(0)
    kx, kt, kwp, kbp, kws, kbs, kpe = jax.random.split(key, 7)

    # x: (B, H, W, n_pr + n_sfc_vars) = (2, 16, 16, 19)
    x = jax.random.normal(kx, (B, H, W, N_PR + N_SFC_VARS), dtype=jnp.float32)
    t0s = jax.random.uniform(kt, (B,), dtype=jnp.float32) * 100.0

    # deterministic conv weights in im2col layout
    k_pr = N_PR_VARS * PATCH[0] * PATCH[1] * PATCH[2]      # Conv3d: Cpr*pd*ph*pw = 128
    k_sfc = TOTAL_SFC * PATCH[1] * PATCH[2]                # Conv2d: Csfc*ph*pw   = 112
    w_pr = 0.02 * jax.random.normal(kwp, (k_pr, LATENT), jnp.float32)
    b_pr = 0.02 * jax.random.normal(kbp, (LATENT,), jnp.float32)
    w_sfc = 0.02 * jax.random.normal(kws, (k_sfc, LATENT), jnp.float32)
    b_sfc = 0.02 * jax.random.normal(kbs, (LATENT,), jnp.float32)

    dp, hp, wp = N_LEVELS // PATCH[0], H // PATCH[1], W // PATCH[2]
    posemb = 0.02 * jax.random.normal(kpe, (dp + 1, hp, wp, LATENT), jnp.float32)

    out = encoder_forward(x, t0s, w_pr, b_pr, w_sfc, b_sfc, posemb)
    jax.block_until_ready(out)
    assert out.shape == (B, dp + 1 + ((-(dp + 1)) % WINDOW[0]), hp, wp, LATENT)
    print("KERNEL_OK")
</pallas_src>

<mosaic_0001>
module attributes {stable_mosaic.version = 11 : i64} {
  func.func @_fused_patch_embed_kernel(%arg0: memref<64x128xbf16, #tpu.memory_space<vmem>>, %arg1: memref<32x128xbf16, #tpu.memory_space<vmem>>, %arg2: memref<128x128xbf16, #tpu.memory_space<vmem>>, %arg3: memref<128x128xbf16, #tpu.memory_space<vmem>>, %arg4: memref<32x128xf32, #tpu.memory_space<vmem>>, %arg5: memref<16x128xf32, #tpu.memory_space<vmem>>, %arg6: memref<2x48x128xf32, #tpu.memory_space<vmem>>) attributes {dimension_semantics = [], scalar_prefetch = 0 : i64, scratch_operands = 0 : i64, tpu.core_type = #tpu.core_type<tc>} {
    %c0 = arith.constant 0 : index
    %c0_0 = arith.constant 0 : index
    %0 = vector.load %arg0[%c0, %c0_0] : memref<64x128xbf16, #tpu.memory_space<vmem>>, vector<64x128xbf16>
    %c0_1 = arith.constant 0 : index
    %c0_2 = arith.constant 0 : index
    %1 = vector.load %arg2[%c0_1, %c0_2] : memref<128x128xbf16, #tpu.memory_space<vmem>>, vector<128x128xbf16>
    %cst = arith.constant dense<0.000000e+00> : vector<64x128xf32>
    %2 = tpu.matmul %0, %1, %cst {dimension_numbers = #tpu.dot_dimension_numbers<[1], [0], [0], [1], [0, 0, 1, 1], [], []>} : vector<64x128xbf16>, vector<128x128xbf16>, vector<64x128xf32> -> vector<64x128xf32>
    %c0_3 = arith.constant 0 : index
    %c0_4 = arith.constant 0 : index
    %3 = vector.load %arg1[%c0_3, %c0_4] : memref<32x128xbf16, #tpu.memory_space<vmem>>, vector<32x128xbf16>
    %cst_5 = arith.constant 0.000000e+00 : f32
    %4 = arith.cmpf one, %3, %3 : vector<32x128xbf16>
    %5 = arith.truncf %cst_5 : f32 to bf16
    %6 = vector.broadcast %5 : bf16 to vector<32x128xbf16>
    %7 = arith.select %4, %6, %3 : vector<32x128xi1>, vector<32x128xbf16>
    %cst_6 = arith.constant 0x7F80 : bf16
    %8 = vector.broadcast %cst_6 : bf16 to vector<32x128xbf16>
    %9 = arith.cmpf oeq, %7, %8 : vector<32x128xbf16>
    %cst_7 = arith.constant 3.389530e+38 : bf16
    %10 = vector.broadcast %cst_7 : bf16 to vector<32x128xbf16>
    %11 = arith.select %9, %10, %7 : vector<32x128xi1>, vector<32x128xbf16>
    %cst_8 = arith.constant 0xFF80 : bf16
    %12 = vector.broadcast %cst_8 : bf16 to vector<32x128xbf16>
    %13 = arith.cmpf oeq, %11, %12 : vector<32x128xbf16>
    %cst_9 = arith.constant -3.389530e+38 : bf16
    %14 = vector.broadcast %cst_9 : bf16 to vector<32x128xbf16>
    %15 = arith.select %13, %14, %11 : vector<32x128xi1>, vector<32x128xbf16>
    %c0_10 = arith.constant 0 : index
    %c0_11 = arith.constant 0 : index
    %16 = vector.load %arg3[%c0_10, %c0_11] : memref<128x128xbf16, #tpu.memory_space<vmem>>, vector<128x128xbf16>
    %cst_12 = arith.constant dense<0.000000e+00> : vector<32x128xf32>
    %17 = tpu.matmul %15, %16, %cst_12 {dimension_numbers = #tpu.dot_dimension_numbers<[1], [0], [0], [1], [0, 0, 1, 1], [], []>} : vector<32x128xbf16>, vector<128x128xbf16>, vector<32x128xf32> -> vector<32x128xf32>
    %18 = vector.shape_cast %2 : vector<64x128xf32> to vector<2x32x128xf32>
    %c0_13 = arith.constant 0 : index
    %c0_14 = arith.constant 0 : index
    %19 = vector.load %arg4[%c0_13, %c0_14] : memref<32x128xf32, #tpu.memory_space<vmem>>, vector<32x128xf32>
    %20 = vector.shape_cast %19 : vector<32x128xf32> to vector<1x32x128xf32>
    %21 = vector.broadcast %20 : vector<1x32x128xf32> to vector<2x32x128xf32>
    %22 = arith.addf %18, %21 : vector<2x32x128xf32>
    %c0_15 = arith.constant 0 : index
    %c0_16 = arith.constant 0 : index
    %c0_17 = arith.constant 0 : index
    %23 = vector.load %arg6[%c0_15, %c0_16, %c0_17] : memref<2x48x128xf32, #tpu.memory_space<vmem>>, vector<2x32x128xf32>
    tpu.vector_store %arg6[%c0_15, %c0_16, %c0_17], %22 {strides = array<i32>} : memref<2x48x128xf32, #tpu.memory_space<vmem>>, vector<2x32x128xf32>,
    %24 = vector.shape_cast %17 : vector<32x128xf32> to vector<2x16x128xf32>
    %c0_18 = arith.constant 0 : index
    %c0_19 = arith.constant 0 : index
    %25 = vector.load %arg5[%c0_18, %c0_19] : memref<16x128xf32, #tpu.memory_space<vmem>>, vector<16x128xf32>
    %26 = vector.shape_cast %25 : vector<16x128xf32> to vector<1x16x128xf32>
    %27 = vector.broadcast %26 : vector<1x16x128xf32> to vector<2x16x128xf32>
    %28 = arith.addf %24, %27 : vector<2x16x128xf32>
    %c0_20 = arith.constant 0 : index
    %c32 = arith.constant 32 : index
    %c0_21 = arith.constant 0 : index
    %29 = vector.load %arg6[%c0_20, %c32, %c0_21] : memref<2x48x128xf32, #tpu.memory_space<vmem>>, vector<2x16x128xf32>
    tpu.vector_store %arg6[%c0_20, %c32, %c0_21], %28 {strides = array<i32>} : memref<2x48x128xf32, #tpu.memory_space<vmem>>, vector<2x16x128xf32>,
    return
  }
}

</mosaic_0001>

<bundles_post_ra>
// kernel: tpu_custom_call.1
= control target key start
LH: loop header
LB: loop body
LE: loop exit
PB: predicated region body
PF: predicated region fallthrough
CT: control target
= control target key end

     0   :  { %11 = vsyncpa [#allocation3], 0  ;;  %s840_s0 = inlined_call_operand.hbm [shape: bf16[64,128], index: 0, kind: input, shape index: {}]   ;;  %s841_s1 = inlined_call_operand.hbm [shape: bf16[32,128], index: 1, kind: input, shape index: {}]   ;;  %s842_s2 = inlined_call_operand.hbm [shape: bf16[128,128], index: 2, kind: input, shape index: {}]   ;;  %s843_s3 = inlined_call_operand.hbm [shape: bf16[128,128], index: 3, kind: input, shape index: {}]   ;;  %s844_s4 = inlined_call_operand.hbm [shape: f32[32,128], index: 4, kind: input, shape index: {}]   ;;  %s845_s5 = inlined_call_operand.hbm [shape: f32[16,128], index: 5, kind: input, shape index: {}]   ;;  %s846_s6 = inlined_call_operand.hbm [shape: f32[2,48,128], index: 6, kind: output, shape index: {}]  }
   0x1   :  { %12 = vsyncpa [#allocation6], 0 }
   0x2   :  { %13 = vsyncpa [#allocation9], 0 }
   0x3   :  { %14 = vsyncpa [#allocation12], 0 }
   0x4   :  { %15 = vsyncpa [#allocation4], 0  ;;  %s33_s23 = sshll.u32 %s841_s1, 4  ;;  %s750_s24 = smov [#allocation5]   ;;  %s34_s23 = int_to_ptr.hbm [resolvable:$true] %s33_s23 }
   0x5   :  { %s35_s25 = sshll.u32 %s750_s24, 4  ;;  %s59_s28 = sshll.u32 %s843_s3, 4  ;;  %s36_s25 = int_to_ptr.vmem [resolvable:$true] %s35_s25  ;;  %s60_s28 = int_to_ptr.hbm [resolvable:$true] %s59_s28 }
   0x6   :  { %s751_s29 = smov 64   ;;  %s752_s30 = smov 4  }
   0x7   :  { %41 = dma.hbm_to_vmem [thread:$0]  %s34_s23, 256, %s36_s25, [#allocation6], %s751_s29, %s751_s29, %s752_s30  }
   0x8   :  { %s753_s7 = smov [#allocation8]   ;;  %s20_s11 = sshll.u32 %s840_s0, 4  ;;  %s21_s11 = int_to_ptr.hbm [resolvable:$true] %s20_s11 }
   0x9   :  { %s61_s8 = sshll.u32 %s753_s7, 4  ;;  %s46_s13 = sshll.u32 %s842_s2, 4  ;;  %s62_s8 = int_to_ptr.vmem [resolvable:$true] %s61_s8  ;;  %s47_s13 = int_to_ptr.hbm [resolvable:$true] %s46_s13 }
   0xa   :  { %67 = dma.hbm_to_vmem [thread:$0]  %s60_s28, 1024, %s62_s8, [#allocation9], %s751_s29, %s751_s29, %s752_s30  }
   0xb   :  { %s754_s14 = smov [#allocation2]   ;;  %s755_s3 = smov [#allocation7]  }
   0xc   :  { %s22_s15 = sshll.u32 %s754_s14, 4  ;;  %s48_s16 = sshll.u32 %s755_s3, 4  ;;  %s23_s15 = int_to_ptr.vmem [resolvable:$true] %s22_s15  ;;  %s49_s16 = int_to_ptr.vmem [resolvable:$true] %s48_s16 }
   0xd   :  { %28 = dma.hbm_to_vmem [thread:$0]  %s21_s11, 512, %s23_s15, [#allocation3], %s751_s29, %s751_s29, %s752_s30  }
   0xe   :  { %s72_s19 = sshll.u32 %s844_s4, 4  ;;  %s756_s0 = smov [#allocation10]   ;;  %s73_s19 = int_to_ptr.hbm [resolvable:$true] %s72_s19 }
   0xf   :  { %54 = dma.hbm_to_vmem [thread:$0]  %s47_s13, 1024, %s49_s16, [#allocation6], %s751_s29, %s751_s29, %s752_s30  }
  0x10   :  { %s74_s20 = sshll.u32 %s756_s0, 4  ;;  %s85_s2 = sshll.u32 %s845_s5, 4  ;;  %s75_s20 = int_to_ptr.vmem [resolvable:$true] %s74_s20  ;;  %s86_s2 = int_to_ptr.hbm [resolvable:$true] %s85_s2 }
  0x11   :  { %s757_s23 = smov 128   ;;  %s758_s24 = smov 8  }
  0x12   :  { %80 = dma.hbm_to_vmem [thread:$0]  %s73_s19, 512, %s75_s20, [#allocation9], %s757_s23, %s757_s23, %s758_s24  }
  0x13   :  { %s759_s25 = smov [#allocation11]  }
  0x14   :  { %s87_s26 = sshll.u32 %s759_s25, 4  ;;  %s88_s26 = int_to_ptr.vmem [resolvable:$true] %s87_s26 }
  0x15   :  { %93 = dma.hbm_to_vmem [thread:$0]  %s86_s2, 256, %s88_s26, [#allocation12], %s757_s23, %s757_s23, %s758_s24  }
  0x16   :  { %740 = dma.done.wait [#allocation3], 512  }
  0x17   :  { %741 = vsyncadd [#allocation3], 4294966784 }
  0x18   :  { %742 = dma.done.wait [#allocation6], 1280  }
  0x19   :  { %743 = vsyncadd [#allocation6], 4294966016 }
  0x1a   :  { %744 = dma.done.wait [#allocation9], 1536  }
  0x1b   :  { %745 = vsyncadd [#allocation9], 4294965760 }
  0x1c   :  { %746 = dma.done.wait [#allocation12], 256  }
  0x1d   :  { %747 = vsyncadd [#allocation12], 4294967040  ;;  %v536_v0 = vld [vmem:[#allocation7 + $0x38] sm:$0xff]  ;;  %v535_v2 = vld [vmem:[#allocation7 + $0x30] sm:$0xff]  ;;  %s760_s4 = smov [#allocation13]   ;;  %s429_s29 = sshll.u32 %s846_s6, 4  ;;  %s430_s29 = int_to_ptr.hbm [resolvable:$true] %s429_s29 }
  0x1e   :  { %v544_v1 = vld [vmem:[#allocation8 + $0x38] sm:$0xff]  ;;  %546 = vmatpush.bf16.msra.mxu3 %v536_v0  ;;  %v543_v3 = vld [vmem:[#allocation8 + $0x30] sm:$0xff]  ;;  %545 = vmatpush.bf16.msra.mxu2 %v536_v0  ;;  %v534_v5 = vld [vmem:[#allocation7 + $0x28] sm:$0xff]  ;;  %s427_s5 = sshll.u32 %s760_s4, 4  ;;  %s428_s5 = int_to_ptr.vmem [resolvable:$true] %s427_s5 }
  0x1f   :  { %374 = vmatpush.bf16.msra.mxu1 %v544_v1  ;;  %217 = vmatpush.bf16.msra.mxu0 %v536_v0  ;;  %v246_v4 = vld [vmem:[#allocation5] sm:$0xf]  ;;  %v542_v6 = vld [vmem:[#allocation8 + $0x28] sm:$0xff]  ;;  %v247_v7 = vld [vmem:[#allocation5 + $0x4] sm:$0xf] }
  0x20   :  { %v250_v8 = vunpack.c.l.bf16 %v246_v4  ;;  %v251_v9 = vunpack.c.l.bf16 %v247_v7  ;;  %v248_v10 = vld [vmem:[#allocation5 + $0x8] sm:$0xf]  ;;  %v249_v11 = vld [vmem:[#allocation5 + $0xc] sm:$0xf]  ;;  %v533_v14 = vld [vmem:[#allocation7 + $0x20] sm:$0xff] }
  0x21   :  { %v252_v12 = vunpack.c.l.bf16 %v248_v10  ;;  %v253_v13 = vunpack.c.l.bf16 %v249_v11  ;;  %v541_v15 = vld [vmem:[#allocation8 + $0x20] sm:$0xff]  ;;  %v532_v22 = vld [vmem:[#allocation7 + $0x18] sm:$0xff]  ;;  %v531_v30 = vld [vmem:[#allocation7 + $0x10] sm:$0xff] }
  0x22   :  { %548 = vmatpush.bf16.msra.mxu3 %v535_v2  ;;  %547 = vmatpush.bf16.msra.mxu2 %v535_v2  ;;  %vm254_vm0 = vcmp.ne.f32.partialorder %v250_v8, %v250_v8  ;;  %vm255_vm1 = vcmp.ne.f32.partialorder %v251_v9, %v251_v9  ;;  %v540_v23 = vld [vmem:[#allocation8 + $0x18] sm:$0xff]  ;;  %v539_v31 = vld [vmem:[#allocation8 + $0x10] sm:$0xff]  ;;  %v530_v34 = vld [vmem:[#allocation7 + $0x8] sm:$0xff] }
  0x23   :  { %375 = vmatpush.bf16.msra.mxu1 %v543_v3  ;;  %218 = vmatpush.bf16.msra.mxu0 %v535_v2  ;;  %vm258_vm2 = vmpackc.low %vm254_vm0, %vm254_vm0  ;;  %vm256_vm4 = vcmp.ne.f32.partialorder %v252_v12, %v252_v12  ;;  %vm257_vm5 = vcmp.ne.f32.partialorder %v253_v13, %v253_v13  ;;  %v538_v35 = vld [vmem:[#allocation8 + $0x8] sm:$0xff]  ;;  %v529_v42 = vld [vmem:[#allocation7] sm:$0xff] }
  0x24   :  { %vm259_vm3 = vmpackc.low %vm255_vm1, %vm255_vm1  ;;  %v262_v16 = vsel %vm258_vm2, 0, %v246_v4  ;;  %v537_v43 = vld [vmem:[#allocation8] sm:$0xff]  ;;  %v526_v48 = vld [vmem:[#allocation2 + $0x8] sm:$0xff] }
  0x25   :  { %v263_v17 = vsel %vm259_vm3, 0, %v247_v7  ;;  %v266_v18 = vunpack.c.l.bf16 %v262_v16  ;;  %vm260_vm6 = vmpackc.low %vm256_vm4, %vm256_vm4  ;;  %v527_v46 = vld [vmem:[#allocation2 + $0x10] sm:$0xff]  ;;  %v525_v49 = vld [vmem:[#allocation2] sm:$0xff] }
  0x26   :  { %550 = vmatpush.bf16.msra.mxu3 %v534_v5  ;;  %549 = vmatpush.bf16.msra.mxu2 %v534_v5  ;;  %v267_v19 = vunpack.c.l.bf16 %v263_v17  ;;  %vm261_vm7 = vmpackc.low %vm257_vm5, %vm257_vm5  ;;  %v264_v20 = vsel %vm260_vm6, 0, %v248_v10  ;;  %v528_v54 = vld [vmem:[#allocation2 + $0x18] sm:$0xff]  ;;  %v413_v56 = vld [vmem:[#allocation11] sm:$0xff] }
  0x27   :  { %376 = vmatpush.bf16.msra.mxu1 %v542_v6  ;;  %219 = vmatpush.bf16.msra.mxu0 %v534_v5  ;;  %vm270_vm8 = vcmp.eq.f32.partialorder %v266_v18, inf  ;;  %v265_v21 = vsel %vm261_vm7, 0, %v249_v11  ;;  %v268_v24 = vunpack.c.l.bf16 %v264_v20  ;;  %v393_v59 = vld [vmem:[#allocation10] sm:$0xff]  ;;  %v395_v62 = vld [vmem:[#allocation10 + $0x10] sm:$0xff]  ;;  %v414_v0 = vld [vmem:[#allocation11 + $0x8] sm:$0xff] }
  0x28   :  { %vm271_vm9 = vcmp.eq.f32.partialorder %v267_v19, inf  ;;  %vm274_vm10 = vmpackc.low %vm270_vm8, %vm270_vm8  ;;  %v269_v26 = vunpack.c.l.bf16 %v265_v21  ;;  %v394_v6 = vld [vmem:[#allocation10 + $0x8] sm:$0xff]  ;;  %v396_v9 = vld [vmem:[#allocation10 + $0x18] sm:$0xff] }
  0x29   :  { %vm275_vm11 = vmpackc.low %vm271_vm9, %vm271_vm9  ;;  %v278_v25 = vsel %vm274_vm10, 2139062143, %v262_v16  ;;  %vm820_vm13 = vcmp.eq.f32.partialorder %v268_v24, inf }
  0x2a   :  { %552 = vmatpush.bf16.msra.mxu3 %v533_v14  ;;  %551 = vmatpush.bf16.msra.mxu2 %v533_v14  ;;  %v279_v27 = vsel %vm275_vm11, 2139062143, %v263_v17  ;;  %v282_v28 = vunpack.c.l.bf16 %v278_v25  ;;  %vm824_vm0 = vcmp.eq.f32.partialorder %v269_v26, inf  ;;  %vm276_vm2 = vmpackc.low %vm820_vm13, %vm820_vm13 }
  0x2b   :  { %377 = vmatpush.bf16.msra.mxu1 %v541_v15  ;;  %220 = vmatpush.bf16.msra.mxu0 %v533_v14  ;;  %v283_v29 = vunpack.c.l.bf16 %v279_v27  ;;  %vm277_vm3 = vmpackc.low %vm824_vm0, %vm824_vm0  ;;  %v280_v38 = vsel %vm276_vm2, 2139062143, %v264_v20 }
  0x2c   :  { %vm286_vm12 = vcmp.eq.f32.partialorder %v282_v28, -inf  ;;  %v281_v41 = vsel %vm277_vm3, 2139062143, %v265_v21  ;;  %v284_v44 = vunpack.c.l.bf16 %v280_v38 }
  0x2d   :  { %vm287_vm14 = vcmp.eq.f32.partialorder %v283_v29, -inf  ;;  %vm290_vm15 = vmpackc.low %vm286_vm12, %vm286_vm12  ;;  %v285_v45 = vunpack.c.l.bf16 %v281_v41 }
  0x2e   :  { %554 = vmatpush.bf16.msra.mxu3 %v532_v22  ;;  %553 = vmatpush.bf16.msra.mxu2 %v532_v22  ;;  %vm291_vm1 = vmpackc.low %vm287_vm14, %vm287_vm14  ;;  %v294_v36 = vsel %vm290_vm15, 4286578559, %v278_v25  ;;  %vm288_vm4 = vcmp.eq.f32.partialorder %v284_v44, -inf }
  0x2f   :  { %378 = vmatpush.bf16.msra.mxu1 %v540_v23  ;;  %221 = vmatpush.bf16.msra.mxu0 %v532_v22  ;;  %v295_v37 = vsel %vm291_vm1, 4286578559, %v279_v27  ;;  %v318_v39 = vunpack.c.l.b16 %v294_v36  ;;  %vm289_vm5 = vcmp.eq.f32.partialorder %v285_v45, -inf  ;;  %vm292_vm6 = vmpackc.low %vm288_vm4, %vm288_vm4 }
  0x30   :  { %v319_v40 = vunpack.c.l.b16 %v295_v37  ;;  %vm293_vm7 = vmpackc.low %vm289_vm5, %vm289_vm5  ;;  %v296_v50 = vsel %vm292_vm6, 4286578559, %v280_v38 }
  0x31   :  { %v297_v51 = vsel %vm293_vm7, 4286578559, %v281_v41  ;;  %v320_v52 = vunpack.c.l.b16 %v296_v50 }
  0x32   :  { %556 = vmatpush.bf16.msra.mxu3 %v531_v30  ;;  %555 = vmatpush.bf16.msra.mxu2 %v531_v30  ;;  %v322_v47 = vpack.c.b16 %v319_v40, %v318_v39  ;;  %v321_v53 = vunpack.c.l.b16 %v297_v51 }
  0x33   :  { %379 = vmatpush.bf16.msra.mxu1 %v539_v31  ;;  %222 = vmatpush.bf16.msra.mxu0 %v531_v30 }
  0x34   :  { %v323_v55 = vpack.c.b16 %v321_v53, %v320_v52 }
  0x36   :  { %558 = vmatpush.bf16.msra.mxu3 %v530_v34  ;;  %557 = vmatpush.bf16.msra.mxu2 %v530_v34 }
  0x37   :  { %380 = vmatpush.bf16.msra.mxu1 %v538_v35  ;;  %223 = vmatpush.bf16.msra.mxu0 %v530_v34 }
  0x3a   :  { %560 = vmatpush.bf16.msra.mxu3 %v529_v42  ;;  %559 = vmatpush.bf16.msra.mxu2 %v529_v42 }
  0x3b   :  { %381 = vmatpush.bf16.msra.mxu1 %v537_v43  ;;  %224 = vmatpush.bf16.msra.mxu0 %v529_v42 }
  0x3d   :  { %235 = vmatmul.bf16.vlgmr.msra.gmra.mxu3 %v527_v46  ;;  %230 = vmatmul.bf16.vlgmr.msra.gmra.mxu2 %v526_v48 }
  0x3e   :  { %382 = vmatmul.bf16.vlgmr.msra.gmra.mxu1 %v322_v47  ;;  %225 = vmatmul.bf16.vlgmr.msra.gmra.mxu0 %v525_v49 }
  0x4d   :  { %240 = vmatmul.bf16.gmra.mxu3 %v528_v54 }
  0x4e   :  { %387 = vmatmul.bf16.gmra.mxu1 %v323_v55 }
  0xbb   :  { %v383_v57 = vpop.f32.mrf.mxu1  ;;  %v226_v60 = vpop.f32.mrf.mxu0 }
  0xbc   :  { %v415_v58 = vadd.f32 %v413_v56, %v383_v57  ;;  %v397_v61 = vadd.f32 %v393_v59, %v226_v60 }
  0xbe   :  { %419 = vst [vmem:[#allocation13 + $0x20] sm:$0xff] %v415_v58 }
  0xbf   :  { %405 = vst [vmem:[#allocation13] sm:$0xff] %v397_v61 }
  0xc0   :  { %v236_v63 = vpop.f32.mrf.mxu3  ;;  %v231_v2 = vpop.f32.mrf.mxu2 }
  0xc1   :  { %v401_v1 = vadd.f32 %v393_v59, %v236_v63  ;;  %v399_v4 = vadd.f32 %v395_v62, %v231_v2 }
  0xc3   :  { %v385_v3 = vpop.f32.mrf.mxu1  ;;  %409 = vst [vmem:[#allocation13 + $0x30] sm:$0xff] %v401_v1  ;;  %v228_v7 = vpop.f32.mrf.mxu0 }
  0xc4   :  { %v416_v5 = vadd.f32 %v414_v0, %v385_v3  ;;  %407 = vst [vmem:[#allocation13 + $0x10] sm:$0xff] %v399_v4  ;;  %v398_v8 = vadd.f32 %v394_v6, %v228_v7 }
  0xc6   :  { %420 = vst [vmem:[#allocation13 + $0x28] sm:$0xff] %v416_v5 }
  0xc7   :  { %406 = vst [vmem:[#allocation13 + $0x8] sm:$0xff] %v398_v8 }
  0xc8   :  { %v238_v10 = vpop.f32.mrf.mxu3  ;;  %v233_v12 = vpop.f32.mrf.mxu2 }
  0xc9   :  { %v402_v11 = vadd.f32 %v394_v6, %v238_v10  ;;  %v400_v14 = vadd.f32 %v396_v9, %v233_v12 }
  0xcb   :  { %v388_v13 = vpop.f32.mrf.mxu1  ;;  %410 = vst [vmem:[#allocation13 + $0x38] sm:$0xff] %v402_v11 }
  0xcc   :  { %v417_v15 = vadd.f32 %v413_v56, %v388_v13  ;;  %408 = vst [vmem:[#allocation13 + $0x18] sm:$0xff] %v400_v14 }
  0xce   :  { %421 = vst [vmem:[#allocation13 + $0x50] sm:$0xff] %v417_v15 }
  0xd0   :  { %v241_v16 = vpop.f32.mrf.mxu3 }
  0xd1   :  { %v403_v17 = vadd.f32 %v395_v62, %v241_v16 }
  0xd3   :  { %v390_v18 = vpop.f32.mrf.mxu1  ;;  %411 = vst [vmem:[#allocation13 + $0x40] sm:$0xff] %v403_v17 }
  0xd4   :  { %v418_v19 = vadd.f32 %v414_v0, %v390_v18 }
  0xd6   :  { %422 = vst [vmem:[#allocation13 + $0x58] sm:$0xff] %v418_v19 }
  0xd8   :  { %v243_v20 = vpop.f32.mrf.mxu3 }
  0xd9   :  { %v404_v21 = vadd.f32 %v396_v9, %v243_v20 }
  0xdb   :  { %412 = vst [vmem:[#allocation13 + $0x48] sm:$0xff] %v404_v21 }
  0xdc   :  { %435 = dma.vmem_to_hbm [thread:$0]  %s428_s5, 1536, %s430_s29, [#allocation4], %s757_s23, %s757_s23, %s758_s24  }
  0xdd   :  { %748 = dma.done.wait [#allocation4], 1536  }
  0xde   :  { %749 = vsyncadd [#allocation4], 4294965760 }
  0xdf   :  { %440 = vsyncpa [#allocation3], 1 }
  0xe0   :  { %441 = vsyncpa [#allocation6], 1 }
  0xe1   :  { %442 = vsyncpa [#allocation9], 1 }
  0xe2   :  { %443 = vsyncpa [#allocation12], 1 }
  0xe3   :  { %444 = vsyncpa [#allocation4], 1 }

</bundles_post_ra>
